<compile_context>
chip_gen: v6e
topology: v6e:2x2x1
jax: 0.10.0
libtpu: 0.0.40
codegen_flags: <defaults>
</compile_context>

<pallas_src>
import functools
import math

import jax
import jax.numpy as jnp
from jax import lax
from jax.experimental import pallas as pl
from jax.experimental.pallas import tpu as pltpu


# ---------------------------------------------------------------------------
# Pass 1: tiled global average pool + excitation -> (B, C) scale
# ---------------------------------------------------------------------------
def _reduce_excite_kernel(x_ref, w1_ref, w2_ref, scale_ref, acc_ref, *, inv_hw):
    # x_ref:     (B, t_red, C)  one spatial tile of the whole batch
    # w1_ref:    (C_red, C)     lin1.weight (PyTorch (out, in) layout, bias=False)
    # w2_ref:    (C, C_red)     lin2.weight
    # scale_ref: (B, C) f32     output, written only on the last grid step
    # acc_ref:   (B, C) f32     VMEM scratch accumulator (persists across steps)
    t = pl.program_id(0)

    @pl.when(t == 0)
    def _init():
        acc_ref[...] = jnp.zeros_like(acc_ref)

    # f32 accumulation of per-channel sums over this spatial tile.
    acc_ref[...] += jnp.sum(x_ref[...].astype(jnp.float32), axis=1)

    @pl.when(t == pl.num_programs(0) - 1)
    def _finalize():
        mean = acc_ref[...] * inv_hw                                # (B, C)
        # mean @ w1.T : contract on the "in" dim of the PyTorch weight.
        h = lax.dot_general(mean, w1_ref[...],
                            (((1,), (1,)), ((), ())),
                            preferred_element_type=jnp.float32)
        h = jnp.maximum(h, 0.0)                                     # (B, C_red)
        s = lax.dot_general(h, w2_ref[...],
                            (((1,), (1,)), ((), ())),
                            preferred_element_type=jnp.float32)
        scale_ref[...] = jax.nn.sigmoid(s)                          # (B, C) f32


# ---------------------------------------------------------------------------
# Pass 2: elementwise x * scale on a lane-dense flattened view
# ---------------------------------------------------------------------------
def _scale_kernel(x_ref, s_ref, o_ref):
    # x_ref/o_ref: (1, rb, t_flat)   t_flat = reps * C (lane-dense)
    # s_ref:       (1, 1, t_flat)    per-batch scale, pre-tiled & pre-cast
    o_ref[...] = x_ref[...] * s_ref[...]


# ---------------------------------------------------------------------------
# Tiling helpers (trace-time Python on static shapes)
# ---------------------------------------------------------------------------
def _pick_block_dim(full, target, multiple=8):
    """Largest divisor of `full` that is <= target and a multiple of `multiple`
    (or equals `full`). Falls back to `full` if nothing qualifies."""
    cap = max(1, min(full, target))
    for d in range(cap, 0, -1):
        if full % d == 0 and (d % multiple == 0 or d == full):
            return d
    return full


def _pick_lane_reps(C, N, target_lanes=2048):
    """Number of spatial positions folded into the lane axis so that the
    flattened last dim (reps*C) is a multiple of 128 (unmasked vst)."""
    need = 128 // math.gcd(C, 128)          # reps must be a multiple of this
    valid = [k for k in range(1, N + 1) if N % k == 0 and k % need == 0]
    if not valid:
        return 1                            # fall back: last dim == C (masked stores)
    fits = [k for k in valid if C * k <= target_lanes]
    return max(fits) if fits else min(valid)


# ---------------------------------------------------------------------------
# Wrapper
# ---------------------------------------------------------------------------
@jax.jit
def se_block_nhwc(x, w1, w2):
    """x: (B, H, W, C) NHWC.  w1: (C_red, C), w2: (C, C_red) (PyTorch Linear layout)."""
    B, H, W, C = x.shape
    C_red = w1.shape[0]
    N = H * W
    esize = x.dtype.itemsize

    # ---------------- pass 1: pooled mean + excitation -> (B, C) scale -------
    x_rows = x.reshape(B, N, C)                                     # free reshape
    t_red = _pick_block_dim(N, max(8, (2 << 20) // max(1, B * C * esize)), 8)
    n_red = N // t_red

    scale = pl.pallas_call(
        functools.partial(_reduce_excite_kernel, inv_hw=1.0 / float(N)),
        out_shape=jax.ShapeDtypeStruct((B, C), jnp.float32),
        grid_spec=pltpu.PrefetchScalarGridSpec(
            num_scalar_prefetch=0,
            grid=(n_red,),
            in_specs=[
                pl.BlockSpec((B, t_red, C), lambda t: (0, t, 0)),
                pl.BlockSpec((C_red, C), lambda t: (0, 0)),   # constant -> DMA'd once
                pl.BlockSpec((C, C_red), lambda t: (0, 0)),   # constant -> DMA'd once
            ],
            out_specs=pl.BlockSpec((B, C), lambda t: (0, 0)),
            scratch_shapes=[pltpu.VMEM((B, C), jnp.float32)],
        ),
        compiler_params=pltpu.CompilerParams(
            dimension_semantics=("arbitrary",),               # reduction axis
        ),
        cost_estimate=pl.CostEstimate(
            flops=int(B * N * C + 4 * B * C * C_red),
            transcendentals=int(B * C),
            bytes_accessed=int(B * N * C * esize + 2 * C * C_red * 4 + B * C * 4),
        ),
    )(x_rows, w1, w2)

    # ---------------- pass 2: lane-dense elementwise scale --------------------
    reps = _pick_lane_reps(C, N)
    t_flat = reps * C
    n_rows = N // reps
    x_flat = x.reshape(B, n_rows, t_flat)                           # free reshape

    # Tiny (B, C) -> (B, 1, t_flat) expansion + cast done once in XLA so the hot
    # loop is a pure vld/vmul/vst kernel with no casts or lane manipulation.
    if reps > 1:
        scale_flat = jnp.tile(scale, (1, reps)).reshape(B, 1, t_flat)
    else:
        scale_flat = scale.reshape(B, 1, C)
    scale_flat = scale_flat.astype(x.dtype)

    rb = _pick_block_dim(n_rows, max(1, (2 << 20) // max(1, t_flat * esize)), 8)
    n_rt = n_rows // rb

    out = pl.pallas_call(
        _scale_kernel,
        out_shape=jax.ShapeDtypeStruct((B, n_rows, t_flat), x.dtype),
        grid_spec=pltpu.PrefetchScalarGridSpec(
            num_scalar_prefetch=0,
            grid=(B, n_rt),
            in_specs=[
                pl.BlockSpec((1, rb, t_flat), lambda b, r: (b, r, 0)),
                pl.BlockSpec((1, 1, t_flat), lambda b, r: (b, 0, 0)),  # re-DMA only on b change
            ],
            out_specs=pl.BlockSpec((1, rb, t_flat), lambda b, r: (b, r, 0)),
        ),
        compiler_params=pltpu.CompilerParams(
            dimension_semantics=("parallel", "parallel"),
        ),
        cost_estimate=pl.CostEstimate(
            flops=int(B * N * C),
            transcendentals=0,
            bytes_accessed=int(2 * B * N * C * esize + B * t_flat * esize),
        ),
    )(x_flat, scale_flat)

    return out.reshape(B, H, W, C)


def _reference(x, w1, w2):
    # pure-JAX reference matching the PyTorch forward
    z = jnp.mean(x, axis=(1, 2), keepdims=True)          # (B,1,1,C)
    z = jnp.maximum(z @ w1.T, 0.0)                        # (B,1,1,C_red)
    z = jax.nn.sigmoid(z @ w2.T)                          # (B,1,1,C)
    return x * z


if __name__ == "__main__":
    B, H, W, C = 2, 16, 16, 32
    reduction = 8
    C_red = C // reduction

    key = jax.random.PRNGKey(0)
    kx, k1, k2 = jax.random.split(key, 3)

    x = jax.random.normal(kx, (B, H, W, C), dtype=jnp.float32)

    # Deterministic Linear weights (bias=False), PyTorch-style uniform(-1/sqrt(fan_in), ...)
    bound1 = 1.0 / jnp.sqrt(C)
    bound2 = 1.0 / jnp.sqrt(C_red)
    w1 = jax.random.uniform(k1, (C_red, C), minval=-bound1, maxval=bound1, dtype=jnp.float32)
    w2 = jax.random.uniform(k2, (C, C_red), minval=-bound2, maxval=bound2, dtype=jnp.float32)

    out = jax.block_until_ready(se_block_nhwc(x, w1, w2))

    ref = _reference(x, w1, w2)
    assert out.shape == (B, H, W, C)
    assert jnp.allclose(out, ref, atol=1e-5, rtol=1e-5), "mismatch vs reference"

    print("KERNEL_OK")
</pallas_src>

<mosaic_0001>
module attributes {stable_mosaic.version = 11 : i64} {
  func.func @_reduce_excite_kernel(%arg0: i32, %arg1: memref<2x256x32xf32, #tpu.memory_space<vmem>>, %arg2: memref<4x32xf32, #tpu.memory_space<vmem>>, %arg3: memref<32x4xf32, #tpu.memory_space<vmem>>, %arg4: memref<2x32xf32, #tpu.memory_space<vmem>>, %arg5: memref<2x32xf32, #tpu.memory_space<vmem>>) attributes {dimension_semantics = [#tpu.dimension_semantics<arbitrary>], iteration_bounds = array<i64: 1>, scalar_prefetch = 0 : i64, scratch_operands = 1 : i64, tpu.core_type = #tpu.core_type<tc>, window_params = [{transform_indices = @transform_0, window_bounds = array<i64: 2, 256, 32>}, {pipeline_mode = #tpu.pipeline_mode<synchronous>, transform_indices = @transform_1, window_bounds = array<i64: 4, 32>}, {pipeline_mode = #tpu.pipeline_mode<synchronous>, transform_indices = @transform_2, window_bounds = array<i64: 32, 4>}, {pipeline_mode = #tpu.pipeline_mode<synchronous>, transform_indices = @transform_3, window_bounds = array<i64: 2, 32>}]} {
    %c0_i32 = arith.constant 0 : i32
    %0 = arith.cmpi eq, %arg0, %c0_i32 : i32
    %1 = arith.extui %0 : i1 to i32
    %c0_i32_0 = arith.constant 0 : i32
    %2 = arith.cmpi ne, %1, %c0_i32_0 : i32
    scf.if %2 {
      %cst_9 = arith.constant 0.000000e+00 : f32
      %11 = vector.broadcast %cst_9 : f32 to vector<2x32xf32>
      %c0_10 = arith.constant 0 : index
      %c0_11 = arith.constant 0 : index
      %12 = vector.load %arg5[%c0_10, %c0_11] : memref<2x32xf32, #tpu.memory_space<vmem>>, vector<2x32xf32>
      tpu.vector_store %arg5[%c0_10, %c0_11], %11 {strides = array<i32>} : memref<2x32xf32, #tpu.memory_space<vmem>>, vector<2x32xf32>,
    } else {
    }
    %c0 = arith.constant 0 : index
    %c0_1 = arith.constant 0 : index
    %3 = vector.load %arg5[%c0, %c0_1] : memref<2x32xf32, #tpu.memory_space<vmem>>, vector<2x32xf32>
    %c0_2 = arith.constant 0 : index
    %c0_3 = arith.constant 0 : index
    %c0_4 = arith.constant 0 : index
    %4 = vector.load %arg1[%c0_2, %c0_3, %c0_4] : memref<2x256x32xf32, #tpu.memory_space<vmem>>, vector<2x256x32xf32>
    %cst = arith.constant dense<0.000000e+00> : vector<2x32xf32>
    %5 = vector.multi_reduction <add>, %4, %cst [1] : vector<2x256x32xf32> to vector<2x32xf32>
    %6 = arith.addf %3, %5 : vector<2x32xf32>
    %c0_5 = arith.constant 0 : index
    %c0_6 = arith.constant 0 : index
    %7 = vector.load %arg5[%c0_5, %c0_6] : memref<2x32xf32, #tpu.memory_space<vmem>>, vector<2x32xf32>
    tpu.vector_store %arg5[%c0_5, %c0_6], %6 {strides = array<i32>} : memref<2x32xf32, #tpu.memory_space<vmem>>, vector<2x32xf32>,
    %c0_i32_7 = arith.constant 0 : i32
    %8 = arith.cmpi eq, %arg0, %c0_i32_7 : i32
    %9 = arith.extui %8 : i1 to i32
    %c0_i32_8 = arith.constant 0 : i32
    %10 = arith.cmpi ne, %9, %c0_i32_8 : i32
    scf.if %10 {
      %c0_9 = arith.constant 0 : index
      %c0_10 = arith.constant 0 : index
      %11 = vector.load %arg5[%c0_9, %c0_10] : memref<2x32xf32, #tpu.memory_space<vmem>>, vector<2x32xf32>
      %cst_11 = arith.constant 3.906250e-03 : f32
      %12 = vector.broadcast %cst_11 : f32 to vector<2x32xf32>
      %13 = arith.mulf %11, %12 : vector<2x32xf32>
      %c0_12 = arith.constant 0 : index
      %c0_13 = arith.constant 0 : index
      %14 = vector.load %arg2[%c0_12, %c0_13] : memref<4x32xf32, #tpu.memory_space<vmem>>, vector<4x32xf32>
      %cst_14 = arith.constant dense<0.000000e+00> : vector<2x4xf32>
      %15 = tpu.matmul %13, %14, %cst_14 {dimension_numbers = #tpu.dot_dimension_numbers<[1], [1], [0], [0], [0, 0, 1, 0], [], []>} : vector<2x32xf32>, vector<4x32xf32>, vector<2x4xf32> -> vector<2x4xf32>
      %cst_15 = arith.constant 0.000000e+00 : f32
      %16 = vector.broadcast %cst_15 : f32 to vector<2x4xf32>
      %17 = arith.maximumf %15, %16 : vector<2x4xf32>
      %c0_16 = arith.constant 0 : index
      %c0_17 = arith.constant 0 : index
      %18 = vector.load %arg3[%c0_16, %c0_17] : memref<32x4xf32, #tpu.memory_space<vmem>>, vector<32x4xf32>
      %cst_18 = arith.constant dense<0.000000e+00> : vector<2x32xf32>
      %19 = tpu.matmul %17, %18, %cst_18 {dimension_numbers = #tpu.dot_dimension_numbers<[1], [1], [0], [0], [0, 0, 1, 0], [], []>} : vector<2x4xf32>, vector<32x4xf32>, vector<2x32xf32> -> vector<2x32xf32>
      %20 = arith.negf %19 : vector<2x32xf32>
      %21 = math.exp %20 : vector<2x32xf32>
      %cst_19 = arith.constant 1.000000e+00 : f32
      %22 = vector.broadcast %cst_19 : f32 to vector<2x32xf32>
      %23 = arith.addf %22, %21 : vector<2x32xf32>
      %24 = arith.divf %22, %23 : vector<2x32xf32>
      %c0_20 = arith.constant 0 : index
      %c0_21 = arith.constant 0 : index
      %25 = vector.load %arg4[%c0_20, %c0_21] : memref<2x32xf32, #tpu.memory_space<vmem>>, vector<2x32xf32>
      tpu.vector_store %arg4[%c0_20, %c0_21], %24 {strides = array<i32>} : memref<2x32xf32, #tpu.memory_space<vmem>>, vector<2x32xf32>,
    } else {
    }
    return
  }
  func.func @transform_0(%arg0: i32) -> (i32, i32, i32) {
    %c0_i32 = arith.constant 0 : i32
    %c0_i32_0 = arith.constant 0 : i32
    %c0_i32_1 = arith.constant 0 : i32
    return %c0_i32, %arg0, %c0_i32_0 : i32, i32, i32
  }
  func.func @transform_1(%arg0: i32) -> (i32, i32) {
    %c0_i32 = arith.constant 0 : i32
    %c0_i32_0 = arith.constant 0 : i32
    %c0_i32_1 = arith.constant 0 : i32
    return %c0_i32, %c0_i32_0 : i32, i32
  }
  func.func @transform_2(%arg0: i32) -> (i32, i32) {
    %c0_i32 = arith.constant 0 : i32
    %c0_i32_0 = arith.constant 0 : i32
    %c0_i32_1 = arith.constant 0 : i32
    return %c0_i32, %c0_i32_0 : i32, i32
  }
  func.func @transform_3(%arg0: i32) -> (i32, i32) {
    %c0_i32 = arith.constant 0 : i32
    %c0_i32_0 = arith.constant 0 : i32
    %c0_i32_1 = arith.constant 0 : i32
    return %c0_i32, %c0_i32_0 : i32, i32
  }
}

module attributes {stable_mosaic.version = 11 : i64} {
  func.func @_scale_kernel(%arg0: i32, %arg1: i32, %arg2: memref<1x4x2048xf32, #tpu.memory_space<vmem>>, %arg3: memref<1x1x2048xf32, #tpu.memory_space<vmem>>, %arg4: memref<1x4x2048xf32, #tpu.memory_space<vmem>>) attributes {dimension_semantics = [#tpu.dimension_semantics<parallel>, #tpu.dimension_semantics<parallel>], iteration_bounds = array<i64: 2, 1>, scalar_prefetch = 0 : i64, scratch_operands = 0 : i64, tpu.core_type = #tpu.core_type<tc>, window_params = [{transform_indices = @transform_0, window_bounds = array<i64: 1, 4, 2048>}, {transform_indices = @transform_1, window_bounds = array<i64: 1, 1, 2048>}, {transform_indices = @transform_2, window_bounds = array<i64: 1, 4, 2048>}]} {
    %c0 = arith.constant 0 : index
    %c0_0 = arith.constant 0 : index
    %c0_1 = arith.constant 0 : index
    %0 = vector.load %arg2[%c0, %c0_0, %c0_1] : memref<1x4x2048xf32, #tpu.memory_space<vmem>>, vector<1x4x2048xf32>
    %c0_2 = arith.constant 0 : index
    %c0_3 = arith.constant 0 : index
    %c0_4 = arith.constant 0 : index
    %1 = vector.load %arg3[%c0_2, %c0_3, %c0_4] : memref<1x1x2048xf32, #tpu.memory_space<vmem>>, vector<1x1x2048xf32>
    %2 = vector.broadcast %1 : vector<1x1x2048xf32> to vector<1x4x2048xf32>
    %3 = arith.mulf %0, %2 : vector<1x4x2048xf32>
    %c0_5 = arith.constant 0 : index
    %c0_6 = arith.constant 0 : index
    %c0_7 = arith.constant 0 : index
    %4 = vector.load %arg4[%c0_5, %c0_6, %c0_7] : memref<1x4x2048xf32, #tpu.memory_space<vmem>>, vector<1x4x2048xf32>
    tpu.vector_store %arg4[%c0_5, %c0_6, %c0_7], %3 {strides = array<i32>} : memref<1x4x2048xf32, #tpu.memory_space<vmem>>, vector<1x4x2048xf32>,
    return
  }
  func.func @transform_0(%arg0: i32, %arg1: i32) -> (i32, i32, i32) {
    %c0_i32 = arith.constant 0 : i32
    %c0_i32_0 = arith.constant 0 : i32
    return %arg0, %arg1, %c0_i32 : i32, i32, i32
  }
  func.func @transform_1(%arg0: i32, %arg1: i32) -> (i32, i32, i32) {
    %c0_i32 = arith.constant 0 : i32
    %c0_i32_0 = arith.constant 0 : i32
    %c0_i32_1 = arith.constant 0 : i32
    return %arg0, %c0_i32, %c0_i32_0 : i32, i32, i32
  }
  func.func @transform_2(%arg0: i32, %arg1: i32) -> (i32, i32, i32) {
    %c0_i32 = arith.constant 0 : i32
    %c0_i32_0 = arith.constant 0 : i32
    return %arg0, %arg1, %c0_i32 : i32, i32, i32
  }
}

</mosaic_0001>

<bundles_post_ra>
// kernel: se_block_nhwc.2
= control target key start
LH: loop header
LB: loop body
LE: loop exit
PB: predicated region body
PF: predicated region fallthrough
CT: control target
= control target key end

     0   :  { %8 = vsyncpa [#allocation4], 0  ;;  %s658_s0 = inlined_call_operand.hbm [shape: f32[2,256,32], index: 0, kind: input, shape index: {}]   ;;  %s659_s1 = inlined_call_operand.hbm [shape: f32[4,32], index: 1, kind: input, shape index: {}]   ;;  %s660_s2 = inlined_call_operand.vmem [shape: f32[32,4], index: 2, kind: input, shape index: {}]   ;;  %s661_s3 = inlined_call_operand.vmem [shape: f32[2,32], index: 3, kind: output, shape index: {}]  }
   0x1   :  { %9 = vsyncpa [#allocation6], 0  ;;  %s529_s12 = smov [#allocation3]  }
   0x2   :  { %s15_s13 = sshll.u32 %s529_s12, 4  ;;  %s16_s13 = int_to_ptr.vmem [resolvable:$true] %s15_s13 }
   0x3   :  { %s493_s14 = scalar_lea.vmem %s16_s13, 8192  ;;  %p498_p1 = scmp.lt.s32.totalorder %s16_s13, %s16_s13 }
   0x4   :  { %p494_p0 = scmp.ne.s32.totalorder %s16_s13, %s493_s14  ;;  %p499_p2 = scmp.lt.s32.totalorder %s493_s14, %s493_s14 }
   0x6   :  { %p500_p3 = por %p499_p2, %p498_p1 }
   0x8   :  { %p501_p4 = pnand %p500_p3, %p494_p0 }
   0xa   :  { %504 = shalt.err (!%p501_p4)
}
   0xb   :  { %s530_s15 = smov 128   ;;  %s531_s16 = smov 8  }
   0xc   :  { %21 = dma.hbm_to_vmem [thread:$0]  %s658_s0, 8192, %s16_s13, [#allocation4], %s530_s15, %s530_s15, %s531_s16  }
   0xd   :  { %s532_s19 = smov [#allocation5]  }
   0xe   :  { %s28_s20 = sshll.u32 %s532_s19, 4  ;;  %s29_s20 = int_to_ptr.vmem [resolvable:$true] %s28_s20 }
   0xf   :  { %s513_s21 = scalar_lea.vmem %s29_s20, 64  ;;  %p518_p6 = scmp.lt.s32.totalorder %s29_s20, %s29_s20 }
  0x10   :  { %p514_p5 = scmp.ne.s32.totalorder %s29_s20, %s513_s21  ;;  %p519_p7 = scmp.lt.s32.totalorder %s513_s21, %s513_s21 }
  0x12   :  { %p520_p8 = por %p519_p7, %p518_p6 }
  0x14   :  { %p521_p9 = pnand %p520_p8, %p514_p5 }
  0x16   :  { %524 = shalt.err (!%p521_p9)
}
  0x17   :  { %31 = dma.hbm_to_vmem [thread:$0]  %s659_s1, 64, %s29_s20, [#allocation6]  }
  0x18   :  { %525 = dma.done.wait [#allocation4], 8192  }
  0x19   :  { %526 = vsyncadd [#allocation4], 4294959104 }
  0x1a   :  { %527 = dma.done.wait [#allocation6], 64  }
  0x1b   :  { %528 = vsyncadd [#allocation6], 4294967232  ;;  %vm44_vm0 = vcmask 254976   ;;  %v533_v0 = vmov 0.0   ;;  %vm534_vm1 = vmmov 0   ;;  %vm111_vm2 = vcmask 261120  }
  0x1c   :  { %45 = vst.msk [vmem:[#allocation2] sm:$0x3] %vm44_vm0, %v533_v0  ;;  %459 = vmatprep.subr.mxu0 %v533_v0  ;;  %464 = vmatprep.subr.mxu1 %v533_v0  ;;  %v47_v1 = vld [vmem:[#allocation3] sm:$0xff]  ;;  %v48_v2 = vld [vmem:[#allocation3 + $0x8] sm:$0xff]  ;;  %v49_v3 = vld [vmem:[#allocation3 + $0x10] sm:$0xff]  ;;  %vm345_vm3 = vcmask 31744  }
  0x1d   :  { %461 = vmatprep.mubr.msk.f32.mxu0 %vm534_vm1, %v533_v0  ;;  %472 = vmatprep.mubr.msk.f32.mxu1 %vm534_vm1, %v533_v0  ;;  %v50_v4 = vld [vmem:[#allocation3 + $0x18] sm:$0xff]  ;;  %v112_v5 = vsel %vm111_vm2, %v47_v1, 0.0  ;;  %v113_v6 = vsel %vm111_vm2, %v48_v2, 0.0  ;;  %v51_v7 = vld [vmem:[#allocation3 + $0x20] sm:$0xff]  ;;  %v115_v9 = vsel %vm111_vm2, %v49_v3, 0.0  ;;  %v52_v11 = vld [vmem:[#allocation3 + $0x28] sm:$0xff] }
  0x1e   :  { %v114_v8 = vadd.f32 %v113_v6, %v112_v5  ;;  %v117_v10 = vsel %vm111_vm2, %v50_v4, 0.0  ;;  %v119_v13 = vsel %vm111_vm2, %v51_v7, 0.0  ;;  %v53_v14 = vld [vmem:[#allocation3 + $0x30] sm:$0xff]  ;;  %v121_v16 = vsel %vm111_vm2, %v52_v11, 0.0  ;;  %v54_v17 = vld [vmem:[#allocation3 + $0x38] sm:$0xff]  ;;  %v55_v20 = vld [vmem:[#allocation3 + $0x40] sm:$0xff] }
  0x1f   :  { %v123_v19 = vsel %vm111_vm2, %v53_v14, 0.0  ;;  %v79_v22 = vld [vmem:[#allocation3 + $0x100] sm:$0xff]  ;;  %v80_v23 = vld [vmem:[#allocation3 + $0x108] sm:$0xff]  ;;  %v81_v24 = vld [vmem:[#allocation3 + $0x110] sm:$0xff]  ;;  %v125_v25 = vsel %vm111_vm2, %v54_v17, 0.0  ;;  %v127_v33 = vsel %vm111_vm2, %v55_v20, 0.0 }
  0x20   :  { %v116_v12 = vadd.f32 %v115_v9, %v114_v8  ;;  %v56_v26 = vld [vmem:[#allocation3 + $0x48] sm:$0xff]  ;;  %v82_v27 = vld [vmem:[#allocation3 + $0x118] sm:$0xff]  ;;  %v181_v29 = vsel %vm111_vm2, %v79_v22, 0.0  ;;  %v182_v30 = vsel %vm111_vm2, %v80_v23, 0.0  ;;  %v184_v31 = vsel %vm111_vm2, %v81_v24, 0.0  ;;  %v83_v32 = vld [vmem:[#allocation3 + $0x120] sm:$0xff] }
  0x21   :  { %v183_v34 = vadd.f32 %v182_v30, %v181_v29  ;;  %v57_v35 = vld [vmem:[#allocation3 + $0x50] sm:$0xff]  ;;  %v186_v37 = vsel %vm111_vm2, %v82_v27, 0.0  ;;  %v84_v38 = vld [vmem:[#allocation3 + $0x128] sm:$0xff]  ;;  %v129_v39 = vsel %vm111_vm2, %v56_v26, 0.0  ;;  %v58_v41 = vld [vmem:[#allocation3 + $0x58] sm:$0xff]  ;;  %v188_v43 = vsel %vm111_vm2, %v83_v32, 0.0 }
  0x22   :  { %v118_v15 = vadd.f32 %v117_v10, %v116_v12  ;;  %v85_v44 = vld [vmem:[#allocation3 + $0x130] sm:$0xff]  ;;  %v131_v45 = vsel %vm111_vm2, %v57_v35, 0.0  ;;  %v59_v47 = vld [vmem:[#allocation3 + $0x60] sm:$0xff]  ;;  %v190_v49 = vsel %vm111_vm2, %v84_v38, 0.0  ;;  %v86_v50 = vld [vmem:[#allocation3 + $0x138] sm:$0xff]  ;;  %v133_v51 = vsel %vm111_vm2, %v58_v41, 0.0 }
  0x23   :  { %v185_v40 = vadd.f32 %v184_v31, %v183_v34  ;;  %v60_v53 = vld [vmem:[#allocation3 + $0x68] sm:$0xff]  ;;  %v192_v55 = vsel %vm111_vm2, %v85_v44, 0.0  ;;  %v87_v56 = vld [vmem:[#allocation3 + $0x140] sm:$0xff]  ;;  %v135_v57 = vsel %vm111_vm2, %v59_v47, 0.0  ;;  %v344_v59 = vld [vmem:[%s660_s2 + $0x18] sm:$0xff]  ;;  %v194_v62 = vsel %vm111_vm2, %v86_v50, 0.0 }
  0x24   :  { %v120_v18 = vadd.f32 %v119_v13, %v118_v15  ;;  %v61_v60 = vld [vmem:[#allocation3 + $0x70] sm:$0xff]  ;;  %v263_v63 = vld [vmem:[#allocation5] sm:$0xf]  ;;  %465 = vmatpush3.xpose.msk.msra.mxu1 %vm345_vm3, %v344_v59  ;;  %v88_v1 = vld [vmem:[#allocation3 + $0x148] sm:$0xff]  ;;  %v137_v2 = vsel %vm111_vm2, %v60_v53, 0.0  ;;  %v196_v7 = vsel %vm111_vm2, %v87_v56, 0.0 }
  0x25   :  { %v187_v46 = vadd.f32 %v186_v37, %v185_v40  ;;  %460 = vmatpush3.xpose.msk.msra.mxu0 %vm111_vm2, %v263_v63  ;;  %466 = vmatprep.subr.mxu1 %v533_v0  ;;  %v343_v4 = vld [vmem:[%s660_s2 + $0x10] sm:$0xff]  ;;  %v62_v5 = vld [vmem:[#allocation3 + $0x78] sm:$0xff]  ;;  %v139_v9 = vsel %vm111_vm2, %v61_v60, 0.0  ;;  %v63_v11 = vld [vmem:[#allocation3 + $0x80] sm:$0xff]  ;;  %v198_v13 = vsel %vm111_vm2, %v88_v1, 0.0  ;;  %vm252_vm4 = vcmask 1041409  }
  0x26   :  { %v122_v21 = vadd.f32 %v121_v16, %v120_v18  ;;  %v89_v8 = vld [vmem:[#allocation3 + $0x150] sm:$0xff]  ;;  %v90_v14 = vld [vmem:[#allocation3 + $0x158] sm:$0xff]  ;;  %v141_v15 = vsel %vm111_vm2, %v62_v5, 0.0  ;;  %v342_v17 = vld [vmem:[%s660_s2 + $0x8] sm:$0xff]  ;;  %v143_v22 = vsel %vm111_vm2, %v63_v11, 0.0 }
  0x27   :  { %v189_v52 = vadd.f32 %v188_v43, %v187_v46  ;;  %v64_v18 = vld [vmem:[#allocation3 + $0x88] sm:$0xff]  ;;  %v200_v20 = vsel %vm111_vm2, %v89_v8, 0.0  ;;  %v65_v24 = vld [vmem:[#allocation3 + $0x90] sm:$0xff]  ;;  %v202_v26 = vsel %vm111_vm2, %v90_v14, 0.0  ;;  %v66_v30 = vld [vmem:[#allocation3 + $0x98] sm:$0xff] }
  0x28   :  { %v124_v28 = vadd.f32 %v123_v19, %v122_v21  ;;  %467 = vmatpush3.xpose.msk.msra.mxu1 %vm345_vm3, %v343_v4  ;;  %v91_v21 = vld [vmem:[#allocation3 + $0x160] sm:$0xff]  ;;  %v92_v27 = vld [vmem:[#allocation3 + $0x168] sm:$0xff]  ;;  %v147_v34 = vsel %vm111_vm2, %v65_v24, 0.0  ;;  %v149_v40 = vsel %vm111_vm2, %v66_v30, 0.0  ;;  %v69_v47 = vld [vmem:[#allocation3 + $0xb0] sm:$0xff] }
  0x29   :  { %v191_v58 = vadd.f32 %v190_v49, %v189_v52  ;;  %468 = vmatprep.subr.mxu1 %v533_v0  ;;  %v204_v32 = vsel %vm111_vm2, %v91_v21, 0.0  ;;  %v206_v38 = vsel %vm111_vm2, %v92_v27, 0.0  ;;  %v95_v44 = vld [vmem:[#allocation3 + $0x180] sm:$0xff]  ;;  %v96_v50 = vld [vmem:[#allocation3 + $0x188] sm:$0xff]  ;;  %v70_v53 = vld [vmem:[#allocation3 + $0xb8] sm:$0xff] }
  0x2a   :  { %v126_v36 = vadd.f32 %v125_v25, %v124_v28  ;;  %v145_v28 = vsel %vm111_vm2, %v64_v18, 0.0  ;;  %v97_v56 = vld [vmem:[#allocation3 + $0x190] sm:$0xff]  ;;  %v71_v59 = vld [vmem:[#allocation3 + $0xc0] sm:$0xff]  ;;  %v157_v63 = vsel %vm111_vm2, %v70_v53, 0.0  ;;  %v100_v11 = vld [vmem:[#allocation3 + $0x1a8] sm:$0xff] }
  0x2b   :  { %v193_v3 = vadd.f32 %v192_v55, %v191_v58  ;;  %v212_v55 = vsel %vm111_vm2, %v95_v44, 0.0  ;;  %v216_v4 = vsel %vm111_vm2, %v97_v56, 0.0  ;;  %v99_v5 = vld [vmem:[#allocation3 + $0x1a0] sm:$0xff]  ;;  %v73_v8 = vld [vmem:[#allocation3 + $0xd0] sm:$0xff]  ;;  %v74_v14 = vld [vmem:[#allocation3 + $0xd8] sm:$0xff] }
  0x2c   :  { %v128_v42 = vadd.f32 %v127_v33, %v126_v36  ;;  %469 = vmatpush3.xpose.msk.msra.mxu1 %vm345_vm3, %v342_v17  ;;  %v93_v33 = vld [vmem:[#allocation3 + $0x170] sm:$0xff]  ;;  %v67_v36 = vld [vmem:[#allocation3 + $0xa0] sm:$0xff]  ;;  %v163_v18 = vsel %vm111_vm2, %v73_v8, 0.0  ;;  %v165_v24 = vsel %vm111_vm2, %v74_v14, 0.0 }
  0x2d   :  { %v195_v10 = vadd.f32 %v194_v62, %v193_v3  ;;  %470 = vmatprep.subr.mxu1 %v533_v0  ;;  %v208_v0 = vsel %vm111_vm2, %v93_v33, 0.0  ;;  %v98_v62 = vld [vmem:[#allocation3 + $0x198] sm:$0xff]  ;;  %v101_v17 = vld [vmem:[#allocation3 + $0x1b0] sm:$0xff] }
  0x2e   :  { %v130_v48 = vadd.f32 %v129_v39, %v128_v42  ;;  %v94_v39 = vld [vmem:[#allocation3 + $0x178] sm:$0xff]  ;;  %v68_v42 = vld [vmem:[#allocation3 + $0xa8] sm:$0xff] }
  0x2f   :  { %v197_v16 = vadd.f32 %v196_v7, %v195_v10  ;;  %v210_v49 = vsel %vm111_vm2, %v94_v39, 0.0  ;;  %v218_v10 = vsel %vm111_vm2, %v98_v62, 0.0 }
  0x30   :  { %v132_v54 = vadd.f32 %v131_v45, %v130_v48  ;;  %v151_v45 = vsel %vm111_vm2, %v67_v36, 0.0 }
  0x31   :  { %v199_v23 = vadd.f32 %v198_v13, %v197_v16  ;;  %v220_v16 = vsel %vm111_vm2, %v99_v5, 0.0 }
  0x32   :  { %v134_v61 = vadd.f32 %v133_v51, %v132_v54  ;;  %v153_v51 = vsel %vm111_vm2, %v68_v42, 0.0 }
  0x33   :  { %v201_v29 = vadd.f32 %v200_v20, %v199_v23  ;;  %v75_v20 = vld [vmem:[#allocation3 + $0xe0] sm:$0xff]  ;;  %v102_v23 = vld [vmem:[#allocation3 + $0x1b8] sm:$0xff] }
  0x34   :  { %v136_v6 = vadd.f32 %v135_v57, %v134_v61  ;;  %v155_v57 = vsel %vm111_vm2, %v69_v47, 0.0  ;;  %v214_v61 = vsel %vm111_vm2, %v96_v50, 0.0  ;;  %v167_v30 = vsel %vm111_vm2, %v75_v20, 0.0  ;;  %v107_v50 = vld [vmem:[#allocation3 + $0x1e0] sm:$0xff] }
  0x35   :  { %v203_v35 = vadd.f32 %v202_v26, %v201_v29  ;;  %v76_v26 = vld [vmem:[#allocation3 + $0xe8] sm:$0xff]  ;;  %v103_v29 = vld [vmem:[#allocation3 + $0x1c0] sm:$0xff] }
  0x36   :  { %v138_v12 = vadd.f32 %v137_v2, %v136_v6  ;;  %v72_v2 = vld [vmem:[#allocation3 + $0xc8] sm:$0xff]  ;;  %v159_v6 = vsel %vm111_vm2, %v71_v59, 0.0  ;;  %v169_v36 = vsel %vm111_vm2, %v76_v26, 0.0 }
  0x37   :  { %v205_v41 = vadd.f32 %v204_v32, %v203_v35  ;;  %v77_v32 = vld [vmem:[#allocation3 + $0xf0] sm:$0xff]  ;;  %v104_v35 = vld [vmem:[#allocation3 + $0x1c8] sm:$0xff] }
  0x38   :  { %v140_v19 = vadd.f32 %v139_v9, %v138_v12  ;;  %v161_v12 = vsel %vm111_vm2, %v72_v2, 0.0  ;;  %v171_v42 = vsel %vm111_vm2, %v77_v32, 0.0  ;;  %v230_v44 = vsel %vm111_vm2, %v104_v35, 0.0 }
  0x39   :  { %v207_v46 = vadd.f32 %v206_v38, %v205_v41  ;;  %v78_v38 = vld [vmem:[#allocation3 + $0xf8] sm:$0xff]  ;;  %v105_v41 = vld [vmem:[#allocation3 + $0x1d0] sm:$0xff] }
  0x3a   :  { %v142_v25 = vadd.f32 %v141_v15, %v140_v19 }
  0x3b   :  { %v209_v52 = vadd.f32 %v208_v0, %v207_v46  ;;  %v173_v46 = vsel %vm111_vm2, %v78_v38, 0.0 }
  0x3c   :  { %v144_v31 = vadd.f32 %v143_v22, %v142_v25  ;;  %v222_v22 = vsel %vm111_vm2, %v100_v11, 0.0 }
  0x3d   :  { %v211_v58 = vadd.f32 %v210_v49, %v209_v52  ;;  %v232_v49 = vsel %vm111_vm2, %v105_v41, 0.0 }
  0x3e   :  { %v146_v37 = vadd.f32 %v145_v28, %v144_v31  ;;  %v224_v28 = vsel %vm111_vm2, %v101_v17, 0.0 }
  0x3f   :  { %v213_v1 = vadd.f32 %v212_v55, %v211_v58  ;;  %v109_v58 = vld [vmem:[#allocation3 + $0x1f0] sm:$0xff] }
  0x40   :  { %v148_v43 = vadd.f32 %v147_v34, %v146_v37  ;;  %v226_v34 = vsel %vm111_vm2, %v102_v23, 0.0 }
  0x41   :  { %v215_v7 = vadd.f32 %v214_v61, %v213_v1  ;;  %v110_v61 = vld [vmem:[#allocation3 + $0x1f8] sm:$0xff]  ;;  %v240_v1 = vsel %vm111_vm2, %v109_v58, 0.0 }
  0x42   :  { %v150_v48 = vadd.f32 %v149_v40, %v148_v43  ;;  %v228_v40 = vsel %vm111_vm2, %v103_v29, 0.0 }
  0x43   :  { %v217_v13 = vadd.f32 %v216_v4, %v215_v7 }
  0x44   :  { %v152_v54 = vadd.f32 %v151_v45, %v150_v48  ;;  %v106_v45 = vld [vmem:[#allocation3 + $0x1d8] sm:$0xff] }
  0x45   :  { %v219_v19 = vadd.f32 %v218_v10, %v217_v13  ;;  %v234_v53 = vsel %vm111_vm2, %v106_v45, 0.0 }
  0x46   :  { %v154_v60 = vadd.f32 %v153_v51, %v152_v54  ;;  %v108_v54 = vld [vmem:[#allocation3 + $0x1e8] sm:$0xff] }
  0x47   :  { %v221_v25 = vadd.f32 %v220_v16, %v219_v19 }
  0x48   :  { %v156_v3 = vadd.f32 %v155_v57, %v154_v60  ;;  %v236_v57 = vsel %vm111_vm2, %v107_v50, 0.0  ;;  %v238_v60 = vsel %vm111_vm2, %v108_v54, 0.0 }
  0x49   :  { %v223_v31 = vadd.f32 %v222_v22, %v221_v25 }
  0x4a   :  { %v158_v9 = vadd.f32 %v157_v63, %v156_v3  ;;  %v242_v3 = vsel %vm111_vm2, %v110_v61, 0.0 }
  0x4b   :  { %v225_v37 = vadd.f32 %v224_v28, %v223_v31 }
  0x4c   :  { %v160_v15 = vadd.f32 %v159_v6, %v158_v9 }
  0x4d   :  { %v227_v43 = vadd.f32 %v226_v34, %v225_v37 }
  0x4e   :  { %v162_v21 = vadd.f32 %v161_v12, %v160_v15  ;;  %v46_v15 = vld [vmem:[#allocation2] sm:$0x3] }
  0x4f   :  { %v229_v47 = vadd.f32 %v228_v40, %v227_v43 }
  0x50   :  { %v164_v27 = vadd.f32 %v163_v18, %v162_v21  ;;  %v341_v21 = vld [vmem:[%s660_s2] sm:$0xff] }
  0x51   :  { %v231_v51 = vadd.f32 %v230_v44, %v229_v47  ;;  %471 = vmatpush3.xpose.msk.msra.mxu1 %vm345_vm3, %v341_v21 }
  0x52   :  { %v166_v33 = vadd.f32 %v165_v24, %v164_v27 }
  0x53   :  { %v233_v55 = vadd.f32 %v232_v49, %v231_v51 }
  0x54   :  { %v168_v39 = vadd.f32 %v167_v30, %v166_v33 }
  0x55   :  { %v235_v59 = vadd.f32 %v234_v53, %v233_v55 }
  0x56   :  { %v170_v0 = vadd.f32 %v169_v36, %v168_v39 }
  0x57   :  { %v237_v63 = vadd.f32 %v236_v57, %v235_v59 }
  0x58   :  { %v172_v48 = vadd.f32 %v171_v42, %v170_v0 }
  0x59   :  { %v239_v2 = vadd.f32 %v238_v60, %v237_v63 }
  0x5a   :  { %v174_v52 = vadd.f32 %v173_v46, %v172_v48 }
  0x5b   :  { %v241_v5 = vadd.f32 %v240_v1, %v239_v2 }
  0x5c   :  { %v175_v56 = vrot.slane %v174_v52, 4 }
  0x5d   :  { %v243_v6 = vadd.f32 %v242_v3, %v241_v5 }
  0x5e   :  { %v176_v62 = vadd.f32 %v175_v56, %v174_v52 }
  0x5f   :  { %v244_v8 = vrot.slane %v243_v6, 4 }
  0x60   :  { %v177_v4 = vrot.slane %v176_v62, 2 }
  0x61   :  { %v245_v9 = vadd.f32 %v244_v8, %v243_v6 }
  0x62   :  { %v178_v7 = vadd.f32 %v177_v4, %v176_v62 }
  0x63   :  { %v246_v11 = vrot.slane %v245_v9, 2 }
  0x64   :  { %v179_v10 = vrot.slane %v178_v7, 1 }
  0x65   :  { %v247_v12 = vadd.f32 %v246_v11, %v245_v9 }
  0x66   :  { %v180_v13 = vadd.f32 %v179_v10, %v178_v7 }
  0x67   :  { %v248_v14 = vrot.slane %v247_v12, 1 }
  0x69   :  { %v249_v16 = vadd.f32 %v248_v14, %v247_v12 }
  0x6b   :  { %v253_v17 = vsel %vm252_vm4, %v249_v16, %v180_v13 }
  0x6c   :  { %v255_v18 = vadd.f32 %v253_v17, %v46_v15 }
  0x6e   :  { %257 = vst.msk [vmem:[#allocation2] sm:$0x3] %vm44_vm0, %v255_v18 }
  0x75   :  { %v261_v19 = vld [vmem:[#allocation2] sm:$0x3] }
  0x76   :  { %v262_v20 = vmul.f32 0.00390625, %v261_v19 }
  0x78   :  { %462 = vmatmul.mubr.msk.f32.vlgmr.msra.gmra.mxu0 %vm111_vm2, %v262_v20 }
 0x138   :  { %v336_v22 = vpop.f32.mrf.mxu0 }
 0x139   :  { %v340_v23 = vmax.f32 %v336_v22, 0.0 }
 0x13a   :  { %v463_v24 = vpop.f32.mrf.mxu0 }
 0x13b   :  { %473 = vmatmul.mubr.msk.f32.vlgmr.msra.gmra.mxu1 %vm345_vm3, %v340_v23 }
 0x1fb   :  { %v427_v25 = vpop.f32.mrf.mxu1 }
 0x1fc   :  { %v451_v26 = vmul.f32 -1.442695, %v427_v25 }
 0x1fd   :  { %v474_v27 = vpop.f32.mrf.mxu1 }
 0x1fe   :  { %481 = vpow2.f32 %v451_v26 }
 0x20b   :  { %v482_v28 = vpop.eup %481 }
 0x20c   :  { %v434_v29 = vadd.f32 1.0, %v482_v28 }
 0x20e   :  { %483 = vrcp.f32 %v434_v29 }
 0x21b   :  { %v484_v30 = vpop.eup %483 }
 0x21c   :  { %437 = vst.msk [vmem:[%s661_s3] sm:$0x3] %vm44_vm0, %v484_v30 }
 0x21d   :  { %442 = vsyncpa [#allocation4], 1 }
 0x21e   :  { %443 = vsyncpa [#allocation6], 1 }

// kernel: se_block_nhwc.3
= control target key start
LH: loop header
LB: loop body
LE: loop exit
PB: predicated region body
PF: predicated region fallthrough
CT: control target
= control target key end

     0   :  { %s486_s9 = smov 0   ;;  %s488_s10 = smov 0   ;;  %s550_s0 = inlined_call_operand.vmem [shape: f32[2,4,2048], index: 0, kind: input, shape index: {}]   ;;  %s551_s1 = inlined_call_operand.vmem [shape: f32[2,1,2048], index: 1, kind: input, shape index: {}]   ;;  %s552_s2 = inlined_call_operand.vmem [shape: f32[2,4,2048], index: 2, kind: output, shape index: {}]  }
   0x1   :  { %s490_s11 = smov 0  }
   0x2 LB: > { %s24_s12 = sadd.s32 1, %s465_s10  ;;  %p413_p0 = scmp.ge.s32.totalorder %s469_s11, 1  ;;  %s469_s11 = sphi %s490_s11, %s12_s11   ;;  %s465_s10 = sphi %s488_s10, %s554_s10   ;;  %s461_s9 = sphi %s486_s9, %s553_s9  }
   0x3   : > { %p26_p1 = scmp.ge.s32.totalorder %s24_s12, 2  ;;  %p141_p2 = scmp.lt.s32.totalorder %s469_s11, 3 }
   0x5   : > { %s556_s12 = smov (%p26_p1, %s24_s12), 0  ;;  %p142_p3 = pnand %p413_p0, %p141_p2 }
   0x6   : > { %p175_p4 = scmp.lt.s32.totalorder (!%p142_p3), %s461_s9, 1 }
   0x7   : > { %145 = sbr.rel (%p142_p3) target bundleno = 31 (0x1f), region = 28 }
   0xc   : > { %v209_v0 = vlaneseq  ;;  %s558_s9 = smov (!%p175_p4, %s461_s9), 1 }
   0xd   : > { %s421_s13 = sshll.u32 %s558_s9, 6  ;;  %s416_s14 = sshll.u32 %s558_s9, 4 }
   0xe   : > { %v210_v1 = vshrl.u32 %v209_v0, 7  ;;  %s513_s17 = scalar_lea.vmem %s550_s0, %s421_s13  ;;  %s187_s20 = scalar_lea.vmem %s551_s1, %s416_s14 }
   0xf   : > { %v205_v10 = vld [vmem:[%s187_s20] sm:$0xff]  ;;  %v198_v16 = vld [vmem:[%s513_s17 + $0x8] sm:$0xff]  ;;  %v199_v24 = vld [vmem:[%s513_s17 + $0x10] sm:$0xff]  ;;  %s527_s23 = scalar_lea.vmem %s552_s2, %s421_s13 }
  0x10   : > { %v211_v2 = vsub.s32 0, %v210_v1  ;;  %v215_v3 = vsub.s32 1, %v210_v1  ;;  %v219_v4 = vsub.s32 2, %v210_v1  ;;  %v223_v5 = vsub.s32 3, %v210_v1  ;;  %v197_v15 = vld [vmem:[%s513_s17] sm:$0xff]  ;;  %v206_v21 = vld [vmem:[%s187_s20 + $0x8] sm:$0xff] }
  0x11   : > { %v227_v6 = vsub.s32 4, %v210_v1  ;;  %v231_v7 = vsub.s32 5, %v210_v1  ;;  %v235_v8 = vsub.s32 6, %v210_v1  ;;  %v239_v9 = vsub.s32 7, %v210_v1  ;;  %v200_v25 = vld [vmem:[%s513_s17 + $0x18] sm:$0xff]  ;;  %v201_v30 = vld [vmem:[%s513_s17 + $0x20] sm:$0xff] }
  0x12   : > { %v212_v11 = vrot.slane %v205_v10, %v211_v2  ;;  %v216_v12 = vrot.slane %v205_v10, %v215_v3  ;;  %v220_v13 = vrot.slane %v205_v10, %v219_v4  ;;  %v224_v14 = vrot.slane %v205_v10, %v223_v5  ;;  %v202_v36 = vld [vmem:[%s513_s17 + $0x28] sm:$0xff]  ;;  %v203_v43 = vld [vmem:[%s513_s17 + $0x30] sm:$0xff]  ;;  %v204_v48 = vld [vmem:[%s513_s17 + $0x38] sm:$0xff] }
  0x13   : > { %v228_v17 = vrot.slane %v205_v10, %v227_v6  ;;  %v232_v18 = vrot.slane %v205_v10, %v231_v7  ;;  %v236_v19 = vrot.slane %v205_v10, %v235_v8  ;;  %v240_v20 = vrot.slane %v205_v10, %v239_v9 }
  0x14   : > { %v273_v22 = vcombine.low %v212_v11, %v216_v12  ;;  %v274_v23 = vcombine.low %v220_v13, %v224_v14  ;;  %v244_v26 = vrot.slane %v206_v21, %v211_v2  ;;  %v248_v27 = vrot.slane %v206_v21, %v215_v3 }
  0x15   : > { %v275_v28 = vcombine.low %v228_v17, %v232_v18  ;;  %v276_v29 = vcombine.low %v236_v19, %v240_v20  ;;  %v252_v31 = vrot.slane %v206_v21, %v219_v4  ;;  %v256_v32 = vrot.slane %v206_v21, %v223_v5 }
  0x16   : > { %v289_v33 = vmul.f32 %v273_v22, %v197_v15  ;;  %v290_v34 = vmul.f32 %v274_v23, %v198_v16  ;;  %v277_v35 = vcombine.low %v244_v26, %v248_v27  ;;  %v260_v37 = vrot.slane %v206_v21, %v227_v6 }
  0x17   : > { %v291_v38 = vmul.f32 %v275_v28, %v199_v24  ;;  %v292_v39 = vmul.f32 %v276_v29, %v200_v25  ;;  %v278_v40 = vcombine.low %v252_v31, %v256_v32  ;;  %v264_v41 = vrot.slane %v206_v21, %v231_v7 }
  0x18   : > { %297 = vst [vmem:[%s527_s23] sm:$0xff] %v289_v33  ;;  %298 = vst [vmem:[%s527_s23 + $0x8] sm:$0xff] %v290_v34  ;;  %v293_v42 = vmul.f32 %v277_v35, %v201_v30  ;;  %v268_v44 = vrot.slane %v206_v21, %v235_v8  ;;  %v272_v45 = vrot.slane %v206_v21, %v239_v9 }
  0x19   : > { %299 = vst [vmem:[%s527_s23 + $0x10] sm:$0xff] %v291_v38  ;;  %300 = vst [vmem:[%s527_s23 + $0x18] sm:$0xff] %v292_v39  ;;  %v294_v46 = vmul.f32 %v278_v40, %v202_v36  ;;  %v279_v47 = vcombine.low %v260_v37, %v264_v41 }
  0x1a   : > { %301 = vst [vmem:[%s527_s23 + $0x20] sm:$0xff] %v293_v42  ;;  %v280_v49 = vcombine.low %v268_v44, %v272_v45 }
  0x1b   : > { %302 = vst [vmem:[%s527_s23 + $0x28] sm:$0xff] %v294_v46  ;;  %v295_v50 = vmul.f32 %v279_v47, %v203_v43 }
  0x1c   : > { %v296_v51 = vmul.f32 %v280_v49, %v204_v48 }
  0x1d   : > { %303 = vst [vmem:[%s527_s23 + $0x30] sm:$0xff] %v295_v50 }
  0x1e   : > { %304 = vst [vmem:[%s527_s23 + $0x38] sm:$0xff] %v296_v51 }
  0x1f PF: > { %s12_s11 = sadd.s32 1, %s469_s11   ;;  %s553_s9 = smov %s465_s10 }
  0x20   : > { %p9_p5 = scmp.ge.s32.totalorder %s12_s11, 4   ;;  %s554_s10 = smov %s556_s12 }
  0x22   :  { %11 = sbr.rel (!%p9_p5) target bundleno = 2 (0x2), region = 61 }

</bundles_post_ra>
